<compile_context>
chip_gen: v7x
topology: tpu7x:2x2x1
jax: 0.10.0
libtpu: 0.0.40
codegen_flags: <defaults>
</compile_context>

<pallas_src>
import functools

import jax
import jax.numpy as jnp
from jax import lax
from jax.experimental import pallas as pl
from jax.experimental.pallas import tpu as pltpu


def _round_down(x, m):
    return (x // m) * m


def bilinear_kernel(uid_ref, iid_ref,        # scalar prefetch (SMEM): (B,) id vectors
                    uemb_hbm, iemb_hbm,      # HBM/ANY refs: full embedding tables
                    bias_ref,                # VMEM block: (TM, 1) user_bias + item_bias
                    out_ref,                 # VMEM block: (TM, TN)
                    ue_buf, ie_buf,          # VMEM scratch: (TN, D) gathered rows
                    dot_cache,               # VMEM scratch: (8, TN) cached dot row
                    sem,                     # DMA semaphores: (2, K)
                    *, batch, tn, k_inflight):
    j = pl.program_id(0)   # output column block -> which dot[] segment
    i = pl.program_id(1)   # output row block    -> which bias rows

    # NOTE: correctness of the per-column-block gather + dot cache relies on
    # (a) scratch persistence across grid steps and (b) grid axis 1 (rows)
    # being the inner, sequentially executed ("arbitrary") axis.  Do NOT mark
    # axis 1 "parallel" or reorder the grid without revisiting this.
    @pl.when(i == 0)
    def _gather_and_dot():
        n_valid = jnp.minimum(tn, batch - j * tn)   # valid columns in this block

        def start_copy(r, slot):
            u_row = uid_ref[j * tn + r]
            i_row = iid_ref[j * tn + r]
            pltpu.make_async_copy(uemb_hbm.at[pl.ds(u_row, 1)],
                                  ue_buf.at[pl.ds(r, 1)],
                                  sem.at[0, slot]).start()
            pltpu.make_async_copy(iemb_hbm.at[pl.ds(i_row, 1)],
                                  ie_buf.at[pl.ds(r, 1)],
                                  sem.at[1, slot]).start()

        # Prime: put up to K row copies (per table) in flight.
        def prime(r, carry):
            start_copy(r, r)
            return carry
        lax.fori_loop(0, jnp.minimum(k_inflight, n_valid), prime, 0)

        # Drain/refill: wait on copy r, immediately reuse its slot for copy r+K.
        def body(r, carry):
            slot = r % k_inflight
            pltpu.make_async_copy(uemb_hbm.at[pl.ds(0, 1)],
                                  ue_buf.at[pl.ds(r, 1)],
                                  sem.at[0, slot]).wait()
            pltpu.make_async_copy(iemb_hbm.at[pl.ds(0, 1)],
                                  ie_buf.at[pl.ds(r, 1)],
                                  sem.at[1, slot]).wait()

            @pl.when(r + k_inflight < n_valid)
            def _():
                start_copy(r + k_inflight, slot)
            return carry
        lax.fori_loop(0, n_valid, body, 0)

        # dot[] for this column block, computed once and laid out lane-major via
        # a tiny (8, D) MXU matmul (avoids a sublane->lane transpose):
        #   dot8[s, c] = sum_d ones[s, d] * prod[c, d] = dot[c]
        # Keep f32 inputs (no bf16 downcast) to match the reference reduction.
        prod = ue_buf[...] * ie_buf[...]                       # (TN, D) f32, VPU
        ones8 = jnp.ones((8, prod.shape[1]), jnp.float32)      # tiny, once per column block
        dot_cache[...] = lax.dot_general(
            ones8, prod,
            dimension_numbers=(((1,), (1,)), ((), ())),
            preferred_element_type=jnp.float32)                # (8, TN)

    # Steady-state per-tile body: broadcast + add + store only.
    out_ref[...] = dot_cache[0:1, :] + bias_ref[...]           # (1,TN)+(TM,1) -> (TM,TN)


def bilinear_forward(user_ids, item_ids,
                     user_emb_table, item_emb_table,
                     user_bias_table, item_bias_table,
                     *, tm=512, tn=1024, k_inflight=8):
    user_ids = user_ids.reshape(-1).astype(jnp.int32)
    item_ids = item_ids.reshape(-1).astype(jnp.int32)
    B = user_ids.shape[0]
    D = user_emb_table.shape[1]

    # Lane-dense tiles (multiple of 128 columns / 8 rows) when B is large enough,
    # otherwise fall back to the full (tiny) extent, which BlockSpec also allows.
    TN = min(tn, _round_down(B, 128)) if B >= 128 else B
    TM = min(tm, _round_down(B, 8)) if B >= 8 else B
    K = max(1, min(k_inflight, TN))

    # TODO(synk): the 4-byte/row bias gather stays as wrapper glue (negligible
    # next to the (B,B) output); pre-adding both biases halves the bias streams.
    bias = (jnp.take(user_bias_table, user_ids, axis=0).reshape(-1, 1)
            + jnp.take(item_bias_table, item_ids, axis=0).reshape(-1, 1)
            ).astype(jnp.float32)

    grid = (pl.cdiv(B, TN), pl.cdiv(B, TM))   # (column blocks, row blocks)
    kernel = functools.partial(bilinear_kernel, batch=B, tn=TN, k_inflight=K)

    return pl.pallas_call(
        kernel,
        out_shape=jax.ShapeDtypeStruct((B, B), jnp.float32),
        grid_spec=pltpu.PrefetchScalarGridSpec(
            num_scalar_prefetch=2,
            grid=grid,
            in_specs=[
                pl.BlockSpec(memory_space=pl.ANY),   # user embedding table (stays in HBM)
                pl.BlockSpec(memory_space=pl.ANY),   # item embedding table (stays in HBM)
                pl.BlockSpec((TM, 1), lambda j, i, uids, iids: (i, 0)),   # combined bias
            ],
            out_specs=pl.BlockSpec((TM, TN), lambda j, i, uids, iids: (i, j)),
            scratch_shapes=[
                pltpu.VMEM((TN, D), jnp.float32),      # gathered user rows
                pltpu.VMEM((TN, D), jnp.float32),      # gathered item rows
                pltpu.VMEM((8, TN), jnp.float32),      # cached dot row (lane-major)
                pltpu.SemaphoreType.DMA((2, K)),       # K-deep DMA pipeline per table
            ],
        ),
        compiler_params=pltpu.CompilerParams(
            # Axis 0 (column blocks) may shard across v7x's two TensorCores; axis 1
            # (row blocks) MUST stay sequential -- the i==0 gather/dot cache needs it.
            dimension_semantics=("parallel", "arbitrary")),
    )(user_ids, item_ids,
      user_emb_table.astype(jnp.float32), item_emb_table.astype(jnp.float32),
      bias)


if __name__ == "__main__":
    num_users = 16
    num_items = 24
    embedding_dim = 32

    key = jax.random.PRNGKey(0)
    k_ue, k_ie, k_ub, k_ib, k_id0, k_id1, k_id2, k_id3 = jax.random.split(key, 8)

    # ScaledEmbedding init: weight ~ N(0, 1/embedding_dim).
    user_emb_table = (jax.random.normal(k_ue, (num_users, embedding_dim), jnp.float32)
                      / embedding_dim)
    item_emb_table = (jax.random.normal(k_ie, (num_items, embedding_dim), jnp.float32)
                      / embedding_dim)
    # ZeroEmbedding inits to zeros; use small non-zero values here so the
    # bias-broadcast path is actually exercised by the check.
    user_bias_table = 0.1 * jax.random.normal(k_ub, (num_users, 1), jnp.float32)
    item_bias_table = 0.1 * jax.random.normal(k_ib, (num_items, 1), jnp.float32)

    def reference(uid, iid):
        ue = jnp.take(user_emb_table, uid, axis=0)
        ie = jnp.take(item_emb_table, iid, axis=0)
        ub = jnp.take(user_bias_table, uid, axis=0).reshape(-1, 1)
        ib = jnp.take(item_bias_table, iid, axis=0).reshape(-1, 1)
        dot = jnp.sum(ue * ie, axis=1)           # (B,)
        return dot + ub + ib                     # (B,) + (B,1) + (B,1) -> (B, B)

    # Test 1: tiny aligned batch.  Test 2: non-tile-multiple batch that
    # exercises multi-block grids, edge clipping, and dot-cache reuse.
    cases = [(8, k_id0, k_id1), (203, k_id2, k_id3)]
    for batch, ku, ki in cases:
        user_ids = jax.random.randint(ku, (batch,), 0, num_users, dtype=jnp.int32)
        item_ids = jax.random.randint(ki, (batch,), 0, num_items, dtype=jnp.int32)

        out = bilinear_forward(user_ids, item_ids,
                               user_emb_table, item_emb_table,
                               user_bias_table, item_bias_table)
        out = jax.block_until_ready(out)
        ref = reference(user_ids, item_ids)

        assert out.shape == (batch, batch)
        err = jnp.max(jnp.abs(out - ref))
        assert jnp.allclose(out, ref, atol=1e-5, rtol=1e-5), \
            f"B={batch}: max abs err {err}"

    print("KERNEL_OK")
</pallas_src>

<mosaic_0001>
module attributes {stable_mosaic.version = 11 : i64} {
  func.func @bilinear_kernel(%arg0: i32, %arg1: i32, %arg2: memref<8xi32, #tpu.memory_space<smem>>, %arg3: memref<8xi32, #tpu.memory_space<smem>>, %arg4: memref<16x32xf32, #tpu.memory_space<any>>, %arg5: memref<24x32xf32, #tpu.memory_space<any>>, %arg6: memref<8x1xf32, #tpu.memory_space<vmem>>, %arg7: memref<8x8xf32, #tpu.memory_space<vmem>>, %arg8: memref<8x32xf32, #tpu.memory_space<vmem>>, %arg9: memref<8x32xf32, #tpu.memory_space<vmem>>, %arg10: memref<8x8xf32, #tpu.memory_space<vmem>>, %arg11: memref<2x8x!tpu.dma_semaphore, #tpu.memory_space<semaphore_mem>>) attributes {dimension_semantics = [#tpu.dimension_semantics<parallel>, #tpu.dimension_semantics<arbitrary>], iteration_bounds = array<i64: 1, 1>, scalar_prefetch = 2 : i64, scratch_operands = 4 : i64, tpu.core_type = #tpu.core_type<tc>, window_params = [{}, {}, {transform_indices = @transform_2, window_bounds = array<i64: 8, 1>}, {transform_indices = @transform_3, window_bounds = array<i64: 8, 8>}]} {
    %c0_i32 = arith.constant 0 : i32
    %0 = arith.cmpi eq, %arg1, %c0_i32 : i32
    %1 = arith.extui %0 : i1 to i32
    %c0_i32_0 = arith.constant 0 : i32
    %2 = arith.cmpi ne, %1, %c0_i32_0 : i32
    scf.if %2 {
      %c8_i32 = arith.constant 8 : i32
      %9 = arith.muli %arg0, %c8_i32 : i32
      %c8_i32_6 = arith.constant 8 : i32
      %10 = arith.subi %c8_i32_6, %9 : i32
      %c8_i32_7 = arith.constant 8 : i32
      %11 = arith.minsi %c8_i32_7, %10 : i32
      %c8_i32_8 = arith.constant 8 : i32
      %12 = arith.minsi %c8_i32_8, %11 : i32
      %c0_i32_9 = arith.constant 0 : i32
      %c0_i32_10 = arith.constant 0 : i32
      %13 = arith.subi %12, %c0_i32_10 : i32
      %14 = arith.addi %c0_i32_10, %13 : i32
      %c1_i32 = arith.constant 1 : i32
      scf.for %arg12 = %c0_i32_10 to %14 step %c1_i32  : i32 {
        %c8_i32_21 = arith.constant 8 : i32
        %23 = arith.muli %arg0, %c8_i32_21 : i32
        %24 = arith.addi %23, %arg12 : i32
        %25 = arith.index_cast %24 : i32 to index
        %26 = memref.load %arg2[%25] : memref<8xi32, #tpu.memory_space<smem>>
        %c8_i32_22 = arith.constant 8 : i32
        %27 = arith.muli %arg0, %c8_i32_22 : i32
        %28 = arith.addi %27, %arg12 : i32
        %29 = arith.index_cast %28 : i32 to index
        %30 = memref.load %arg3[%29] : memref<8xi32, #tpu.memory_space<smem>>
        %c0_i32_23 = arith.constant 0 : i32
        %c0_i32_24 = arith.constant 0 : i32
        %31 = tpu.memref_slice %arg4[%26, %c0_i32_24] : memref<16x32xf32, #tpu.memory_space<any>> -> memref<1x32xf32, #tpu.memory_space<any>>
        %c0_i32_25 = arith.constant 0 : i32
        %32 = tpu.memref_slice %arg8[%arg12, %c0_i32_25] : memref<8x32xf32, #tpu.memory_space<vmem>> -> memref<1x32xf32, #tpu.memory_space<vmem>>
        %33 = tpu.memref_slice %arg11[%c0_i32_23, %arg12] : memref<2x8x!tpu.dma_semaphore, #tpu.memory_space<semaphore_mem>> -> memref<1x1x!tpu.dma_semaphore, #tpu.memory_space<semaphore_mem>>
        %34 = tpu.memref_squeeze %33 : memref<1x1x!tpu.dma_semaphore, #tpu.memory_space<semaphore_mem>> -> memref<!tpu.dma_semaphore, #tpu.memory_space<semaphore_mem>>
        tpu.enqueue_dma source(%31 : memref<1x32xf32, #tpu.memory_space<any>>) target(%32 : memref<1x32xf32, #tpu.memory_space<vmem>>) target_semaphore(%34 : memref<!tpu.dma_semaphore, #tpu.memory_space<semaphore_mem>>)
        %c1_i32_26 = arith.constant 1 : i32
        %c0_i32_27 = arith.constant 0 : i32
        %35 = tpu.memref_slice %arg5[%30, %c0_i32_27] : memref<24x32xf32, #tpu.memory_space<any>> -> memref<1x32xf32, #tpu.memory_space<any>>
        %c0_i32_28 = arith.constant 0 : i32
        %36 = tpu.memref_slice %arg9[%arg12, %c0_i32_28] : memref<8x32xf32, #tpu.memory_space<vmem>> -> memref<1x32xf32, #tpu.memory_space<vmem>>
        %37 = tpu.memref_slice %arg11[%c1_i32_26, %arg12] : memref<2x8x!tpu.dma_semaphore, #tpu.memory_space<semaphore_mem>> -> memref<1x1x!tpu.dma_semaphore, #tpu.memory_space<semaphore_mem>>
        %38 = tpu.memref_squeeze %37 : memref<1x1x!tpu.dma_semaphore, #tpu.memory_space<semaphore_mem>> -> memref<!tpu.dma_semaphore, #tpu.memory_space<semaphore_mem>>
        tpu.enqueue_dma source(%35 : memref<1x32xf32, #tpu.memory_space<any>>) target(%36 : memref<1x32xf32, #tpu.memory_space<vmem>>) target_semaphore(%38 : memref<!tpu.dma_semaphore, #tpu.memory_space<semaphore_mem>>)
      }
      %c0_i32_11 = arith.constant 0 : i32
      %c0_i32_12 = arith.constant 0 : i32
      %15 = arith.subi %11, %c0_i32_12 : i32
      %16 = arith.addi %c0_i32_12, %15 : i32
      %c1_i32_13 = arith.constant 1 : i32
      scf.for %arg12 = %c0_i32_12 to %16 step %c1_i32_13  : i32 {
        %c8_i32_21 = arith.constant 8 : i32
        %c0_i32_22 = arith.constant 0 : i32
        %23 = arith.cmpi eq, %c8_i32_21, %c0_i32_22 : i32
        %c1_i32_23 = arith.constant 1 : i32
        %24 = arith.select %23, %c1_i32_23, %c8_i32_21 : i32
        %25 = arith.remsi %arg12, %24 : i32
        %c0_i32_24 = arith.constant 0 : i32
        %26 = arith.cmpi ne, %25, %c0_i32_24 : i32
        %c0_i32_25 = arith.constant 0 : i32
        %27 = arith.cmpi slt, %25, %c0_i32_25 : i32
        %c0_i32_26 = arith.constant 0 : i32
        %28 = arith.cmpi slt, %24, %c0_i32_26 : i32
        %29 = arith.xori %27, %28 : i1
        %30 = arith.andi %29, %26 : i1
        %31 = arith.addi %25, %24 : i32
        %32 = arith.select %30, %31, %25 : i32
        %c0_i32_27 = arith.constant 0 : i32
        %c0_i32_28 = arith.constant 0 : i32
        %c0_i32_29 = arith.constant 0 : i32
        %33 = tpu.memref_slice %arg4[%c0_i32_28, %c0_i32_29] : memref<16x32xf32, #tpu.memory_space<any>> -> memref<1x32xf32, #tpu.memory_space<any>>
        %c0_i32_30 = arith.constant 0 : i32
        %34 = tpu.memref_slice %arg8[%arg12, %c0_i32_30] : memref<8x32xf32, #tpu.memory_space<vmem>> -> memref<1x32xf32, #tpu.memory_space<vmem>>
        %35 = tpu.memref_slice %arg11[%c0_i32_27, %32] : memref<2x8x!tpu.dma_semaphore, #tpu.memory_space<semaphore_mem>> -> memref<1x1x!tpu.dma_semaphore, #tpu.memory_space<semaphore_mem>>
        %36 = tpu.memref_squeeze %35 : memref<1x1x!tpu.dma_semaphore, #tpu.memory_space<semaphore_mem>> -> memref<!tpu.dma_semaphore, #tpu.memory_space<semaphore_mem>>
        tpu.wait_dma2 semaphore(%36 : memref<!tpu.dma_semaphore, #tpu.memory_space<semaphore_mem>>) src(%33 : memref<1x32xf32, #tpu.memory_space<any>>) dst(%34 : memref<1x32xf32, #tpu.memory_space<vmem>>)
        %c1_i32_31 = arith.constant 1 : i32
        %c0_i32_32 = arith.constant 0 : i32
        %c0_i32_33 = arith.constant 0 : i32
        %37 = tpu.memref_slice %arg5[%c0_i32_32, %c0_i32_33] : memref<24x32xf32, #tpu.memory_space<any>> -> memref<1x32xf32, #tpu.memory_space<any>>
        %c0_i32_34 = arith.constant 0 : i32
        %38 = tpu.memref_slice %arg9[%arg12, %c0_i32_34] : memref<8x32xf32, #tpu.memory_space<vmem>> -> memref<1x32xf32, #tpu.memory_space<vmem>>
        %39 = tpu.memref_slice %arg11[%c1_i32_31, %32] : memref<2x8x!tpu.dma_semaphore, #tpu.memory_space<semaphore_mem>> -> memref<1x1x!tpu.dma_semaphore, #tpu.memory_space<semaphore_mem>>
        %40 = tpu.memref_squeeze %39 : memref<1x1x!tpu.dma_semaphore, #tpu.memory_space<semaphore_mem>> -> memref<!tpu.dma_semaphore, #tpu.memory_space<semaphore_mem>>
        tpu.wait_dma2 semaphore(%40 : memref<!tpu.dma_semaphore, #tpu.memory_space<semaphore_mem>>) src(%37 : memref<1x32xf32, #tpu.memory_space<any>>) dst(%38 : memref<1x32xf32, #tpu.memory_space<vmem>>)
        %c8_i32_35 = arith.constant 8 : i32
        %41 = arith.addi %arg12, %c8_i32_35 : i32
        %42 = arith.cmpi slt, %41, %11 : i32
        %43 = arith.extui %42 : i1 to i32
        %c0_i32_36 = arith.constant 0 : i32
        %44 = arith.cmpi ne, %43, %c0_i32_36 : i32
        scf.if %44 {
          %c8_i32_37 = arith.constant 8 : i32
          %45 = arith.addi %arg12, %c8_i32_37 : i32
          %c8_i32_38 = arith.constant 8 : i32
          %46 = arith.muli %arg0, %c8_i32_38 : i32
          %47 = arith.addi %46, %45 : i32
          %48 = arith.index_cast %47 : i32 to index
          %49 = memref.load %arg2[%48] : memref<8xi32, #tpu.memory_space<smem>>
          %c8_i32_39 = arith.constant 8 : i32
          %50 = arith.muli %arg0, %c8_i32_39 : i32
          %51 = arith.addi %50, %45 : i32
          %52 = arith.index_cast %51 : i32 to index
          %53 = memref.load %arg3[%52] : memref<8xi32, #tpu.memory_space<smem>>
          %c0_i32_40 = arith.constant 0 : i32
          %c0_i32_41 = arith.constant 0 : i32
          %54 = tpu.memref_slice %arg4[%49, %c0_i32_41] : memref<16x32xf32, #tpu.memory_space<any>> -> memref<1x32xf32, #tpu.memory_space<any>>
          %c0_i32_42 = arith.constant 0 : i32
          %55 = tpu.memref_slice %arg8[%45, %c0_i32_42] : memref<8x32xf32, #tpu.memory_space<vmem>> -> memref<1x32xf32, #tpu.memory_space<vmem>>
          %56 = tpu.memref_slice %arg11[%c0_i32_40, %32] : memref<2x8x!tpu.dma_semaphore, #tpu.memory_space<semaphore_mem>> -> memref<1x1x!tpu.dma_semaphore, #tpu.memory_space<semaphore_mem>>
          %57 = tpu.memref_squeeze %56 : memref<1x1x!tpu.dma_semaphore, #tpu.memory_space<semaphore_mem>> -> memref<!tpu.dma_semaphore, #tpu.memory_space<semaphore_mem>>
          tpu.enqueue_dma source(%54 : memref<1x32xf32, #tpu.memory_space<any>>) target(%55 : memref<1x32xf32, #tpu.memory_space<vmem>>) target_semaphore(%57 : memref<!tpu.dma_semaphore, #tpu.memory_space<semaphore_mem>>)
          %c1_i32_43 = arith.constant 1 : i32
          %c0_i32_44 = arith.constant 0 : i32
          %58 = tpu.memref_slice %arg5[%53, %c0_i32_44] : memref<24x32xf32, #tpu.memory_space<any>> -> memref<1x32xf32, #tpu.memory_space<any>>
          %c0_i32_45 = arith.constant 0 : i32
          %59 = tpu.memref_slice %arg9[%45, %c0_i32_45] : memref<8x32xf32, #tpu.memory_space<vmem>> -> memref<1x32xf32, #tpu.memory_space<vmem>>
          %60 = tpu.memref_slice %arg11[%c1_i32_43, %32] : memref<2x8x!tpu.dma_semaphore, #tpu.memory_space<semaphore_mem>> -> memref<1x1x!tpu.dma_semaphore, #tpu.memory_space<semaphore_mem>>
          %61 = tpu.memref_squeeze %60 : memref<1x1x!tpu.dma_semaphore, #tpu.memory_space<semaphore_mem>> -> memref<!tpu.dma_semaphore, #tpu.memory_space<semaphore_mem>>
          tpu.enqueue_dma source(%58 : memref<1x32xf32, #tpu.memory_space<any>>) target(%59 : memref<1x32xf32, #tpu.memory_space<vmem>>) target_semaphore(%61 : memref<!tpu.dma_semaphore, #tpu.memory_space<semaphore_mem>>)
        } else {
        }
      }
      %c0_14 = arith.constant 0 : index
      %c0_15 = arith.constant 0 : index
      %17 = vector.load %arg8[%c0_14, %c0_15] : memref<8x32xf32, #tpu.memory_space<vmem>>, vector<8x32xf32>
      %c0_16 = arith.constant 0 : index
      %c0_17 = arith.constant 0 : index
      %18 = vector.load %arg9[%c0_16, %c0_17] : memref<8x32xf32, #tpu.memory_space<vmem>>, vector<8x32xf32>
      %19 = arith.mulf %17, %18 : vector<8x32xf32>
      %cst = arith.constant 1.000000e+00 : f32
      %20 = vector.broadcast %cst : f32 to vector<8x32xf32>
      %cst_18 = arith.constant dense<0.000000e+00> : vector<8x8xf32>
      %21 = tpu.matmul %20, %19, %cst_18 {dimension_numbers = #tpu.dot_dimension_numbers<[1], [1], [0], [0], [0, 0, 1, 0], [], []>} : vector<8x32xf32>, vector<8x32xf32>, vector<8x8xf32> -> vector<8x8xf32>
      %c0_19 = arith.constant 0 : index
      %c0_20 = arith.constant 0 : index
      %22 = vector.load %arg10[%c0_19, %c0_20] : memref<8x8xf32, #tpu.memory_space<vmem>>, vector<8x8xf32>
      tpu.vector_store %arg10[%c0_19, %c0_20], %21 {strides = array<i32>} : memref<8x8xf32, #tpu.memory_space<vmem>>, vector<8x8xf32>,
    } else {
    }
    %c0 = arith.constant 0 : index
    %c0_1 = arith.constant 0 : index
    %3 = vector.load %arg10[%c0, %c0_1] : memref<8x8xf32, #tpu.memory_space<vmem>>, vector<1x8xf32>
    %c0_2 = arith.constant 0 : index
    %c0_3 = arith.constant 0 : index
    %4 = vector.load %arg6[%c0_2, %c0_3] : memref<8x1xf32, #tpu.memory_space<vmem>>, vector<8x1xf32>
    %5 = vector.broadcast %3 : vector<1x8xf32> to vector<8x8xf32>
    %6 = vector.broadcast %4 : vector<8x1xf32> to vector<8x8xf32>
    %7 = arith.addf %5, %6 : vector<8x8xf32>
    %c0_4 = arith.constant 0 : index
    %c0_5 = arith.constant 0 : index
    %8 = vector.load %arg7[%c0_4, %c0_5] : memref<8x8xf32, #tpu.memory_space<vmem>>, vector<8x8xf32>
    tpu.vector_store %arg7[%c0_4, %c0_5], %7 {strides = array<i32>} : memref<8x8xf32, #tpu.memory_space<vmem>>, vector<8x8xf32>,
    return
  }
  func.func @transform_2(%arg0: i32, %arg1: i32, %arg2: memref<8xi32, #tpu.memory_space<smem>>, %arg3: memref<8xi32, #tpu.memory_space<smem>>) -> (i32, i32) {
    %c0_i32 = arith.constant 0 : i32
    %c0_i32_0 = arith.constant 0 : i32
    return %arg1, %c0_i32 : i32, i32
  }
  func.func @transform_3(%arg0: i32, %arg1: i32, %arg2: memref<8xi32, #tpu.memory_space<smem>>, %arg3: memref<8xi32, #tpu.memory_space<smem>>) -> (i32, i32) {
    %c0_i32 = arith.constant 0 : i32
    return %arg1, %arg0 : i32, i32
  }
}

</mosaic_0001>

<bundles_post_ra>
// kernel: tpu_custom_call.1
= control target key start
LH: loop header
LB: loop body
LE: loop exit
PB: predicated region body
PF: predicated region fallthrough
CT: control target
= control target key end

     0   :  { %s784_s0 = inlined_call_operand.hbm [shape: s32[8], index: 0, kind: input, shape index: {}]   ;;  %s785_s2 = inlined_call_operand.vmem [shape: f32[16,32], index: 2, kind: input, shape index: {}]   ;;  %s786_s3 = inlined_call_operand.hbm [shape: f32[24,32], index: 3, kind: input, shape index: {}]   ;;  %s787_s4 = inlined_call_operand.vmem [shape: f32[8,1], index: 4, kind: input, shape index: {}]   ;;  %s788_s5 = inlined_call_operand.hbm [shape: f32[8,8], index: 5, kind: output, shape index: {}]   ;;  %s789_s1 = inlined_call_operand.hbm [shape: s32[8], index: 1, kind: input, shape index: {}]  }
   0x1   :  { %s523_s20 = scalar_lea.hbm %s784_s0, 16 }
   0x2   :  { %p524_p0 = scmp.ne.s32.totalorder %s784_s0, %s523_s20  ;;  %p527_p1 = scmp.lt.u32.totalorder %s523_s20, %s784_s0 }
   0x4   :  { %p529_p2 = pnand %p527_p1, %p524_p0 }
   0x6   :  { %532 = shalt.err (!%p529_p2)  }
   0x7   :  { %s637_s25 = smov [#allocation7]   ;;  %s533_s30 = scalar_lea.hbm %s789_s1, 16 }
   0x8   :  { %11 = dma.hbm_to_smem %s784_s0, 16, %s637_s25, [#allocation6] }
   0x9   :  { %p534_p3 = scmp.ne.s32.totalorder %s789_s1, %s533_s30  ;;  %p537_p4 = scmp.lt.u32.totalorder %s533_s30, %s789_s1 }
   0xb   :  { %p539_p5 = pnand %p537_p4, %p534_p3 }
   0xd   :  { %542 = shalt.err (!%p539_p5)  }
   0xe   :  { %s638_s10 = smov [#allocation8]  }
   0xf   :  { %13 = dma.hbm_to_smem %s789_s1, 16, %s638_s10, [#allocation6] }
  0x10   :  { %621 = dma.done.wait [#allocation6], 32 }
  0x11   :  { %622 = vsyncadd [#allocation6], 4294967264 }
  0x12   :  { %15 = sfence }
  0x13   :  { %16 = vsyncpa [#allocation10], 0  ;;  %s699_s0 = smov 0  }
  0x14 LB: > { %s36_s13 = sld [smem:[#allocation7 + %s631_s0]]  ;;  %s39_s17 = scalar_lea.vmem [#allocation2], %s631_s0  ;;  %s631_s0 = sphi %s699_s0, %s32_s0  }
  0x15   : > { %s37_s14 = sld [smem:[#allocation8 + %s631_s0]]  ;;  %s40_s18 = scalar_lea.sflag [#allocation5], %s631_s0 }
  0x1a   : > { %s38_s1 = scalar_lea.vmem %s785_s2, %s36_s13 }
  0x1b   : > { %v58_v0 = vld [vmem:[%s38_s1] sm:$0x1] }
  0x1c   : > { %59 = vst [vmem:[%s39_s17] sm:$0x1] %v58_v0 }
  0x1d   : > { %84 = vsyncadd %s40_s18, 16  ;;  %s465_s19 = sshll.u32 %s37_s14, 4  ;;  %s425_s23 = scalar_lea.sflag %s40_s18, 8 [#allocation5] }
  0x1e   : > { %s86_s22 = scalar_lea.hbm %s786_s3, %s465_s19  ;;  %s87_s24 = scalar_lea.vmem [#allocation3], %s631_s0 }
  0x1f   : > { %s97_s25 = sshll.u32 %s87_s24, 4  ;;  %s543_s26 = scalar_lea.hbm %s86_s22, 16  ;;  %s98_s25 = int_to_ptr.vmem [resolvable:$true] %s97_s25 }
  0x20   : > { %p544_p6 = scmp.ne.s32.totalorder %s86_s22, %s543_s26  ;;  %s545_s29 = scalar_lea.hbm %s786_s3, 384 }
  0x21   : > { %p546_p7 = scmp.lt.u32.totalorder %s86_s22, %s786_s3  ;;  %p547_p8 = scmp.lt.u32.totalorder %s545_s29, %s543_s26 }
  0x22   : > { %p549_p10 = scmp.lt.u32.totalorder %s543_s26, %s86_s22 }
  0x23   : > { %p548_p9 = por %p547_p8, %p546_p7 }
  0x25   : > { %p550_p11 = por %p549_p10, %p548_p9 }
  0x27   : > { %p551_p12 = pnand %p550_p11, %p544_p6 }
  0x29   : > { %554 = shalt.err (!%p551_p12)  }
  0x2a   : > { %s555_s9 = scalar_lea.vmem %s98_s25, 16  ;;  %s639_s10 = smov [#allocation3]  }
  0x2b   : > { %p556_p13 = scmp.ne.s32.totalorder %s98_s25, %s555_s9  ;;  %s557_s11 = sshll.u32 %s639_s10, 4  ;;  %s725_s11 = int_to_ptr.vmem [resolvable:$false] %s557_s11 }
  0x2c   : > { %s559_s12 = scalar_lea.vmem %s725_s11, 128  ;;  %p560_p0 = scmp.lt.s32.totalorder %s98_s25, %s725_s11 }
  0x2d   : > { %p561_p1 = scmp.lt.s32.totalorder %s559_s12, %s555_s9 }
  0x2f   : > { %p562_p2 = por %p561_p1, %p560_p0 }
  0x31   : > { %p563_p3 = pnand %p562_p2, %p556_p13 }
  0x33   : > { %566 = shalt.err (!%p563_p3)  }
  0x34   : > { %100 = dma.hbm_to_vmem [thread:$0]  %s86_s22, 16, %s98_s25, %s425_s23 }
  0x35   : > { %s32_s0 = sadd.s32 1, %s631_s0  }
  0x36   : > { %p31_p4 = scmp.ge.s32.totalorder %s32_s0, 8 }
  0x37   :  { %s734_s13 = smov (%p31_p4), 0  }
  0x38   :  { %34 = sbr.rel (!%p31_p4) target bundleno = 20 (0x14), region = 161 }
  0x3f LB: > { %p107_p5 = scmp.lt.s32.totalorder %s635_s13, 0  ;;  %s108_s14 = ssub.s32 0, %s635_s13  ;;  %s635_s13 = sphi %s734_s13, %s104_s13  }
  0x40   : > { %s466_s15 = smin.u32 %s635_s13, %s108_s14 }
  0x41   : > { %s110_s16 = sand.u32 7, %s466_s15  }
  0x42   : > { %s111_s1 = ssub.s32 0, %s110_s16 }
  0x43   : > { %s791_s1 = smov (!%p107_p5, %s111_s1), %s110_s16 }
  0x44   : > { %p468_p6 = scmp.lt.s32.totalorder %s791_s1, 0  ;;  %s117_s17 = sadd.s32 8, %s791_s1 }
  0x46   : > { %s793_s17 = smov (!%p468_p6, %s117_s17), %s791_s1 }
  0x47   : > { %s119_s0 = scalar_lea.sflag [#allocation5], %s793_s17 }
  0x48   : > { %623 = dma.done.wait %s119_s0, 16 }
  0x49   : > { %624 = vsyncadd %s119_s0, 4294967280  ;;  %s742_s18 = scalar_lea.sflag %s119_s0, 8 [#allocation5] }
  0x4a   : > { %625 = dma.done.wait %s742_s18, 16 }
  0x4b   : > { %626 = vsyncadd %s742_s18, 4294967280  ;;  %s127_s19 = sadd.s32 8, %s635_s13 }
  0x4c   : > { %p469_p7 = scmp.ge.s32.totalorder %s127_s19, 8 }
  0x4d   : > { %s133_s20 = sld [smem:[#allocation7 + %s127_s19]] (!%p469_p7)  ;;  %s430_s25 = scalar_lea.vmem (!%p469_p7), [#allocation2], %s635_s13 }
  0x4e   : > { %131 = sbr.rel (%p469_p7) target bundleno = 108 (0x6c), region = 61  ;;  %s134_s21 = sld [smem:[#allocation8 + %s127_s19]] (!%p469_p7) }
  0x53   : > { %s135_s24 = scalar_lea.vmem (!%p469_p7), %s785_s2, %s133_s20 }
  0x54   : > { %v154_v1 = vld [vmem:[%s135_s24] sm:$0x1] (!%p469_p7) }
  0x55   : > { %471 = vst [vmem:[%s430_s25 + $0x8] sm:$0x1] %v154_v1 }
  0x56   : > { %180 = vsyncadd %s119_s0, 16  ;;  %s472_s26 = sshll.u32 %s134_s21, 4  ;;  %s437_s6 = scalar_lea.vmem [#allocation3], %s635_s13 }
  0x57   : > { %s182_s30 = scalar_lea.hbm %s786_s3, %s472_s26  ;;  %s438_s7 = scalar_lea.vmem %s437_s6, 8 [#allocation3] }
  0x58   : > { %s191_s8 = sshll.u32 %s438_s7, 4  ;;  %s567_s9 = scalar_lea.hbm %s182_s30, 16  ;;  %s192_s8 = int_to_ptr.vmem [resolvable:$true] %s191_s8 }
  0x59   : > { %p568_p8 = scmp.ne.s32.totalorder %s182_s30, %s567_s9  ;;  %p570_p9 = scmp.lt.u32.totalorder %s182_s30, %s786_s3 }
  0x5a   : > { %p571_p10 = scmp.lt.u32.totalorder %s545_s29, %s567_s9  ;;  %p573_p12 = scmp.lt.u32.totalorder %s567_s9, %s182_s30 }
  0x5c   : > { %p572_p11 = por %p571_p10, %p570_p9 }
  0x5e   : > { %p574_p13 = por %p573_p12, %p572_p11 }
  0x60   : > { %p575_p0 = pnand %p574_p13, %p568_p8 }
  0x62   : > { %578 = shalt.err (!%p575_p0)  }
  0x63   : > { %s579_s1 = scalar_lea.vmem %s192_s8, 16  ;;  %p584_p2 = scmp.lt.s32.totalorder %s192_s8, %s725_s11 }
  0x64   : > { %p580_p1 = scmp.ne.s32.totalorder %s192_s8, %s579_s1  ;;  %p585_p3 = scmp.lt.s32.totalorder %s559_s12, %s579_s1 }
  0x66   : > { %p586_p4 = por %p585_p3, %p584_p2 }
  0x68   : > { %p587_p5 = pnand %p586_p4, %p580_p1 }
  0x6a   : > { %590 = shalt.err (!%p587_p5)  }
  0x6b   : > { %194 = dma.hbm_to_vmem [thread:$0]  %s182_s30, 16, %s192_s8, %s742_s18 }
  0x6c PF: > { %s104_s13 = sadd.s32 1, %s635_s13  }
  0x6d   : > { %p103_p6 = scmp.ge.s32.totalorder %s104_s13, 8 }
  0x6e   :  { %v196_v3 = vld [vmem:[#allocation3] sm:$0xff] (%p103_p6)  ;;  %vm198_vm0 = vcmask (%p103_p6), 261120   ;;  %v640_v4 = vmov (%p103_p6), 0.0   ;;  %vm641_vm1 = vmmov (%p103_p6), 0   ;;  %v278_v6 = vld [vmem:[%s787_s4] sm:$0xff] (%p103_p6)  ;;  %v642_v7 = vmov (%p103_p6), 0  }
  0x6f   :  { %106 = sbr.rel (!%p103_p6) target bundleno = 63 (0x3f), region = 172  ;;  %494 = vmatprep.subr.mxu0 (%p103_p6), %v640_v4  ;;  %496 = vmatprep.mubr.msk.f32.mxu0 (%p103_p6), %vm641_vm1, %v640_v4  ;;  %v643_v8 = vmov (%p103_p6), 1.0   ;;  %vm275_vm2 = vcmask (%p103_p6), 64512   ;;  %s644_s2 = smov (%p103_p6), [#allocation9]  }
  0x70   :  { %522 = vset.pattern.permute.xlu0 (%p103_p6), %v642_v7  ;;  %s297_s3 = sshll.u32 (%p103_p6), %s644_s2, 4  ;;  %s298_s3 = int_to_ptr.vmem [resolvable:$true] %s297_s3 }
  0x71   :  { %285 = vperm.xlu0 (%p103_p6), %522, %v278_v6   ;;  %s591_s29 = scalar_lea.vmem (%p103_p6), %s298_s3, 128  ;;  %p596_p8 = scmp.lt.s32.totalorder (%p103_p6), %s298_s3, %s298_s3 }
  0x72   :  { %p592_p7 = scmp.ne.s32.totalorder (%p103_p6), %s298_s3, %s591_s29  ;;  %p597_p9 = scmp.lt.s32.totalorder (%p103_p6), %s591_s29, %s591_s29 }
  0x73   :  { %v195_v2 = vld [vmem:[#allocation2] sm:$0xff] (%p103_p6) }
  0x74   :  { %v197_v5 = vmul.f32 (%p103_p6), %v196_v3, %v195_v2  ;;  %p598_p10 = por (%p103_p6), %p597_p9, %p596_p8 }
  0x76   :  { %495 = vmatpush3.xpose.msk.msra.mxu0 %vm198_vm0, %v197_v5  ;;  %p599_p11 = pnand %p598_p10, %p592_p7 }
  0x79   :  { %497 = vmatmul.mubr.msk.f32.vlgmr.msra.gmra.mrb[0].mxu0 %vm198_vm0, %v643_v8 }
  0xf0   :  { %v286_v11 = vpop.permute.xlu0 %285 }
 0x14c   :  { %v271_v9 = vpop.f32.mrb[0].mxu0 }
 0x14d   :  { %276 = vst.msk [vmem:[#allocation4] sm:$0xff] %vm275_vm2, %v271_v9  ;;  %v498_v10 = vpop.f32.mrb[1].mxu0 }
 0x154   :  { %v475_v12 = vld [vmem:[#allocation4] ss:$0 sm:$0xff] }
 0x155   :  { %v288_v13 = vadd.f32 %v475_v12, %v286_v11 }
 0x157   :  { %290 = vst.msk [vmem:[#allocation9] sm:$0xff] %vm275_vm2, %v288_v13 }
 0x158   :  { %602 = shalt.err (!%p599_p11)
}
 0x159   :  { %s603_s12 = scalar_lea.hbm %s788_s5, 128 }
 0x15a   :  { %p604_p12 = scmp.ne.s32.totalorder %s788_s5, %s603_s12  ;;  %p607_p13 = scmp.lt.u32.totalorder %s603_s12, %s788_s5 }
 0x15c   :  { %p609_p0 = pnand %p607_p13, %p604_p12 }
 0x15e   :  { %612 = shalt.err (!%p609_p0)
}
 0x15f   :  { %300 = dma.vmem_to_hbm [thread:$0]  %s298_s3, 128, %s788_s5, [#allocation10]  }
 0x160   :  { %627 = dma.done.wait [#allocation10], 128  }
 0x161   :  { %628 = vsyncadd [#allocation10], 4294967168 }
 0x162   :  { %304 = vsyncpa [#allocation10], 1 }
 0x163   :  { %305 = vsyncmov [#allocation5] }
 0x166   :  { %s306_s23 = vpop.sfrf %305 }
 0x167   :  { %p476_p1 = scmp.ne.s32.totalorder %s306_s23, 0 }
 0x169   :  { %310 = shalt.err (%p476_p1)  }
 0x16a   :  { %312 = vsyncmov [#allocation5 + $0x1] }
 0x16d   :  { %s313_s24 = vpop.sfrf %312 }
 0x16e   :  { %p477_p2 = scmp.ne.s32.totalorder %s313_s24, 0 }
 0x170   :  { %317 = shalt.err (%p477_p2)  }
 0x171   :  { %319 = vsyncmov [#allocation5 + $0x2] }
 0x174   :  { %s320_s25 = vpop.sfrf %319 }
 0x175   :  { %p478_p3 = scmp.ne.s32.totalorder %s320_s25, 0 }
 0x177   :  { %324 = shalt.err (%p478_p3)  }
 0x178   :  { %326 = vsyncmov [#allocation5 + $0x3] }
 0x17b   :  { %s327_s26 = vpop.sfrf %326 }
 0x17c   :  { %p479_p4 = scmp.ne.s32.totalorder %s327_s26, 0 }
 0x17e   :  { %331 = shalt.err (%p479_p4)  }
 0x17f   :  { %333 = vsyncmov [#allocation5 + $0x4] }
 0x182   :  { %s334_s5 = vpop.sfrf %333 }
 0x183   :  { %p480_p5 = scmp.ne.s32.totalorder %s334_s5, 0 }
 0x185   :  { %338 = shalt.err (%p480_p5)  }
 0x186   :  { %340 = vsyncmov [#allocation5 + $0x5] }
 0x189   :  { %s341_s27 = vpop.sfrf %340 }
 0x18a   :  { %p481_p6 = scmp.ne.s32.totalorder %s341_s27, 0 }
 0x18c   :  { %345 = shalt.err (%p481_p6)  }
 0x18d   :  { %347 = vsyncmov [#allocation5 + $0x6] }
 0x190   :  { %s348_s28 = vpop.sfrf %347 }
 0x191   :  { %p482_p7 = scmp.ne.s32.totalorder %s348_s28, 0 }
 0x193   :  { %352 = shalt.err (%p482_p7)  }
 0x194   :  { %354 = vsyncmov [#allocation5 + $0x7] }
 0x197   :  { %s355_s30 = vpop.sfrf %354 }
 0x198   :  { %p483_p8 = scmp.ne.s32.totalorder %s355_s30, 0 }
 0x19a   :  { %359 = shalt.err (%p483_p8)  }
 0x19b   :  { %361 = vsyncmov [#allocation5 + $0x8] }
 0x19e   :  { %s362_s6 = vpop.sfrf %361 }
 0x19f   :  { %p484_p9 = scmp.ne.s32.totalorder %s362_s6, 0 }
 0x1a1   :  { %366 = shalt.err (%p484_p9)  }
 0x1a2   :  { %368 = vsyncmov [#allocation5 + $0x9] }
 0x1a5   :  { %s369_s7 = vpop.sfrf %368 }
 0x1a6   :  { %p485_p10 = scmp.ne.s32.totalorder %s369_s7, 0 }
 0x1a8   :  { %373 = shalt.err (%p485_p10)  }
 0x1a9   :  { %375 = vsyncmov [#allocation5 + $0xa] }
 0x1ac   :  { %s376_s8 = vpop.sfrf %375 }
 0x1ad   :  { %p486_p11 = scmp.ne.s32.totalorder %s376_s8, 0 }
 0x1af   :  { %380 = shalt.err (%p486_p11)  }
 0x1b0   :  { %382 = vsyncmov [#allocation5 + $0xb] }
 0x1b3   :  { %s383_s9 = vpop.sfrf %382 }
 0x1b4   :  { %p487_p12 = scmp.ne.s32.totalorder %s383_s9, 0 }
 0x1b6   :  { %387 = shalt.err (%p487_p12)  }
 0x1b7   :  { %389 = vsyncmov [#allocation5 + $0xc] }
 0x1ba   :  { %s390_s10 = vpop.sfrf %389 }
 0x1bb   :  { %p488_p13 = scmp.ne.s32.totalorder %s390_s10, 0 }
 0x1bd   :  { %394 = shalt.err (%p488_p13)  }
 0x1be   :  { %396 = vsyncmov [#allocation5 + $0xd] }
 0x1c1   :  { %s397_s14 = vpop.sfrf %396 }
 0x1c2   :  { %p489_p0 = scmp.ne.s32.totalorder %s397_s14, 0 }
 0x1c4   :  { %401 = shalt.err (%p489_p0)  }
 0x1c5   :  { %403 = vsyncmov [#allocation5 + $0xe] }
 0x1c8   :  { %s404_s15 = vpop.sfrf %403 }
 0x1c9   :  { %p490_p1 = scmp.ne.s32.totalorder %s404_s15, 0 }
 0x1cb   :  { %408 = shalt.err (%p490_p1)  }
 0x1cc   :  { %410 = vsyncmov [#allocation5 + $0xf] }
 0x1cf   :  { %s411_s16 = vpop.sfrf %410 }
 0x1d0   :  { %p491_p2 = scmp.ne.s32.totalorder %s411_s16, 0 }
 0x1d2   :  { %415 = shalt.err (%p491_p2)  }

</bundles_post_ra>
